<compile_context>
chip_gen: v5e
topology: v5e:2x2
jax: 0.10.0
libtpu: 0.0.40
codegen_flags: <defaults>
</compile_context>

<pallas_src>
import functools

import jax
import jax.numpy as jnp
from jax.experimental import pallas as pl
from jax.experimental.pallas import tpu as pltpu


def _stats_kernel(x_ref, out_ref, acc_ref, *, inv_count):
    # x_ref: (1, C, HW_tile) tile of the input.
    # acc_ref: (C, 2) VMEM scratch  -> [:, 0] = sum, [:, 1] = sum of squares.
    # out_ref: (C, 2) output        -> [:, 0] = scale = rsqrt(var),
    #                                  [:, 1] = shift = -mean * rsqrt(var).
    n = pl.program_id(0)
    t = pl.program_id(1)

    @pl.when((n == 0) & (t == 0))
    def _():
        acc_ref[...] = jnp.zeros_like(acc_ref)

    x = x_ref[0].astype(jnp.float32)                     # (C, HW_tile)
    acc_ref[:, 0:1] += jnp.sum(x, axis=1, keepdims=True)        # per-channel sum
    acc_ref[:, 1:2] += jnp.sum(x * x, axis=1, keepdims=True)    # per-channel sum sq

    @pl.when((n == pl.num_programs(0) - 1) & (t == pl.num_programs(1) - 1))
    def _():
        tot = acc_ref[...]
        mean = tot[:, 0:1] * inv_count
        var = tot[:, 1:2] * inv_count - mean * mean      # biased variance, eps = 0
        rstd = jax.lax.rsqrt(var)
        out_ref[...] = jnp.concatenate([rstd, -mean * rstd], axis=1)


def _norm_kernel(ss_ref, x_ref, o_ref):
    # ss_ref: (C, 2) per-channel (scale, shift); x_ref/o_ref: (1, C, HW_tile).
    x = x_ref[...].astype(jnp.float32)
    scale = ss_ref[:, 0:1][None]                         # (1, C, 1)
    shift = ss_ref[:, 1:2][None]                         # (1, C, 1)
    o_ref[...] = (x * scale + shift).astype(o_ref.dtype)


def _pick_hw_tile(hw, c, target_bytes=2 * 1024 * 1024):
    """Largest multiple of 128 that divides hw with block bytes <= target."""
    if hw % 128 != 0:
        # Full-extent block is always legal; edge stores are masked by the compiler.
        return hw
    cap = max(128, (target_bytes // (c * 4)) // 128 * 128)
    t = min(hw, cap)
    while hw % t != 0:
        t -= 128
    return t


def batchnorm2d_pallas(x):
    """x: (N, C, H, W) -> (N, C, H, W), per-channel batch normalization (eps=0)."""
    N, C, H, W = x.shape
    HW = H * W
    x3 = x.reshape(N, C, HW)  # contiguous reshape — no HBM transpose

    hw_tile = _pick_hw_tile(HW, C)
    num_t = HW // hw_tile
    itemsize = x.dtype.itemsize
    inv_count = 1.0 / float(N * HW)

    # Pass 1: per-channel stats -> (scale, shift).
    stats = pl.pallas_call(
        functools.partial(_stats_kernel, inv_count=inv_count),
        out_shape=jax.ShapeDtypeStruct((C, 2), jnp.float32),
        grid=(N, num_t),
        in_specs=[pl.BlockSpec((1, C, hw_tile), lambda n, t: (n, 0, t))],
        out_specs=pl.BlockSpec((C, 2), lambda n, t: (0, 0)),
        scratch_shapes=[pltpu.VMEM((C, 2), jnp.float32)],
        compiler_params=pltpu.CompilerParams(
            dimension_semantics=("arbitrary", "arbitrary")),
        cost_estimate=pl.CostEstimate(
            flops=3 * N * C * HW,
            transcendentals=C,
            bytes_accessed=N * C * HW * itemsize + C * 2 * 4),
    )(x3)

    # Pass 2: normalize (elementwise, fully parallel -> both TCs on v7x).
    y3 = pl.pallas_call(
        _norm_kernel,
        out_shape=jax.ShapeDtypeStruct((N, C, HW), x.dtype),
        grid=(N, num_t),
        in_specs=[pl.BlockSpec((C, 2), lambda n, t: (0, 0)),
                  pl.BlockSpec((1, C, hw_tile), lambda n, t: (n, 0, t))],
        out_specs=pl.BlockSpec((1, C, hw_tile), lambda n, t: (n, 0, t)),
        compiler_params=pltpu.CompilerParams(
            dimension_semantics=("parallel", "parallel")),
        cost_estimate=pl.CostEstimate(
            flops=2 * N * C * HW,
            transcendentals=0,
            bytes_accessed=2 * N * C * HW * itemsize + C * 2 * 4),
    )(stats, x3)

    return y3.reshape(N, C, H, W)


if __name__ == "__main__":
    key = jax.random.PRNGKey(0)
    # n_class = 4 channels; NCHW input as the PyTorch module expects.
    x = jax.random.normal(key, (2, 4, 16, 16), dtype=jnp.float32)

    y = batchnorm2d_pallas(x)
    y = jax.block_until_ready(y)

    # Pure-JAX reference (BatchNorm2d, affine=False, eps=0, batch stats).
    mean = jnp.mean(x, axis=(0, 2, 3), keepdims=True)
    var = jnp.mean((x - mean) ** 2, axis=(0, 2, 3), keepdims=True)
    y_ref = (x - mean) / jnp.sqrt(var)
    assert jnp.allclose(y, y_ref, atol=1e-4, rtol=1e-4), "mismatch vs reference"

    print("KERNEL_OK")
</pallas_src>

<mosaic_0001>
module attributes {stable_mosaic.version = 11 : i64} {
  func.func @_stats_kernel(%arg0: i32, %arg1: i32, %arg2: memref<1x4x256xf32, #tpu.memory_space<vmem>>, %arg3: memref<4x2xf32, #tpu.memory_space<vmem>>, %arg4: memref<4x2xf32, #tpu.memory_space<vmem>>) attributes {dimension_semantics = [#tpu.dimension_semantics<arbitrary>, #tpu.dimension_semantics<arbitrary>], iteration_bounds = array<i64: 2, 1>, scalar_prefetch = 0 : i64, scratch_operands = 1 : i64, tpu.core_type = #tpu.core_type<tc>, window_params = [{transform_indices = @transform_0, window_bounds = array<i64: 1, 4, 256>}, {pipeline_mode = #tpu.pipeline_mode<synchronous>, transform_indices = @transform_1, window_bounds = array<i64: 4, 2>}]} {
    %c0_i32 = arith.constant 0 : i32
    %0 = arith.cmpi eq, %arg0, %c0_i32 : i32
    %c0_i32_0 = arith.constant 0 : i32
    %1 = arith.cmpi eq, %arg1, %c0_i32_0 : i32
    %2 = arith.andi %0, %1 : i1
    %3 = arith.extui %2 : i1 to i32
    %c0_i32_1 = arith.constant 0 : i32
    %4 = arith.cmpi ne, %3, %c0_i32_1 : i32
    scf.if %4 {
      %cst_14 = arith.constant 0.000000e+00 : f32
      %23 = vector.broadcast %cst_14 : f32 to vector<4x2xf32>
      %c0_15 = arith.constant 0 : index
      %c0_16 = arith.constant 0 : index
      %24 = vector.load %arg4[%c0_15, %c0_16] : memref<4x2xf32, #tpu.memory_space<vmem>>, vector<4x2xf32>
      tpu.vector_store %arg4[%c0_15, %c0_16], %23 {strides = array<i32>} : memref<4x2xf32, #tpu.memory_space<vmem>>, vector<4x2xf32>,
    } else {
    }
    %c0 = arith.constant 0 : index
    %c0_2 = arith.constant 0 : index
    %c0_3 = arith.constant 0 : index
    %5 = vector.load %arg2[%c0, %c0_2, %c0_3] : memref<1x4x256xf32, #tpu.memory_space<vmem>>, vector<1x4x256xf32>
    %6 = vector.shape_cast %5 : vector<1x4x256xf32> to vector<4x256xf32>
    %c0_4 = arith.constant 0 : index
    %c0_5 = arith.constant 0 : index
    %7 = vector.load %arg4[%c0_4, %c0_5] : memref<4x2xf32, #tpu.memory_space<vmem>>, vector<4x1xf32>
    %cst = arith.constant dense<0.000000e+00> : vector<4xf32>
    %8 = vector.multi_reduction <add>, %6, %cst [1] : vector<4x256xf32> to vector<4xf32>
    %9 = vector.shape_cast %8 : vector<4xf32> to vector<4x1xf32>
    %10 = arith.addf %7, %9 : vector<4x1xf32>
    %c0_6 = arith.constant 0 : index
    %c0_7 = arith.constant 0 : index
    %11 = vector.load %arg4[%c0_6, %c0_7] : memref<4x2xf32, #tpu.memory_space<vmem>>, vector<4x1xf32>
    tpu.vector_store %arg4[%c0_6, %c0_7], %10 {strides = array<i32>} : memref<4x2xf32, #tpu.memory_space<vmem>>, vector<4x1xf32>,
    %c0_8 = arith.constant 0 : index
    %c1 = arith.constant 1 : index
    %12 = vector.load %arg4[%c0_8, %c1] : memref<4x2xf32, #tpu.memory_space<vmem>>, vector<4x1xf32>
    %13 = arith.mulf %6, %6 : vector<4x256xf32>
    %cst_9 = arith.constant dense<0.000000e+00> : vector<4xf32>
    %14 = vector.multi_reduction <add>, %13, %cst_9 [1] : vector<4x256xf32> to vector<4xf32>
    %15 = vector.shape_cast %14 : vector<4xf32> to vector<4x1xf32>
    %16 = arith.addf %12, %15 : vector<4x1xf32>
    %c0_10 = arith.constant 0 : index
    %c1_11 = arith.constant 1 : index
    %17 = vector.load %arg4[%c0_10, %c1_11] : memref<4x2xf32, #tpu.memory_space<vmem>>, vector<4x1xf32>
    tpu.vector_store %arg4[%c0_10, %c1_11], %16 {strides = array<i32>} : memref<4x2xf32, #tpu.memory_space<vmem>>, vector<4x1xf32>,
    %c1_i32 = arith.constant 1 : i32
    %18 = arith.cmpi eq, %arg0, %c1_i32 : i32
    %c0_i32_12 = arith.constant 0 : i32
    %19 = arith.cmpi eq, %arg1, %c0_i32_12 : i32
    %20 = arith.andi %18, %19 : i1
    %21 = arith.extui %20 : i1 to i32
    %c0_i32_13 = arith.constant 0 : i32
    %22 = arith.cmpi ne, %21, %c0_i32_13 : i32
    scf.if %22 {
      %c0_14 = arith.constant 0 : index
      %c0_15 = arith.constant 0 : index
      %23 = vector.load %arg4[%c0_14, %c0_15] : memref<4x2xf32, #tpu.memory_space<vmem>>, vector<4x2xf32>
      %24 = vector.extract_strided_slice %23 {offsets = [0, 0], sizes = [4, 1], strides = [1, 1]} : vector<4x2xf32> to vector<4x1xf32>
      %cst_16 = arith.constant 0.001953125 : f32
      %25 = vector.broadcast %cst_16 : f32 to vector<4x1xf32>
      %26 = arith.mulf %24, %25 : vector<4x1xf32>
      %27 = vector.extract_strided_slice %23 {offsets = [0, 1], sizes = [4, 1], strides = [1, 1]} : vector<4x2xf32> to vector<4x1xf32>
      %cst_17 = arith.constant 0.001953125 : f32
      %28 = vector.broadcast %cst_17 : f32 to vector<4x1xf32>
      %29 = arith.mulf %27, %28 : vector<4x1xf32>
      %30 = arith.mulf %26, %26 : vector<4x1xf32>
      %31 = arith.subf %29, %30 : vector<4x1xf32>
      %32 = math.rsqrt %31 : vector<4x1xf32>
      %cst_18 = arith.constant 0.000000e+00 : f32
      %33 = vector.broadcast %cst_18 : f32 to vector<4x1xf32>
      %34 = arith.subf %33, %26 : vector<4x1xf32>
      %35 = arith.mulf %34, %32 : vector<4x1xf32>
      %36 = tpu.concatenate %32, %35 in 1 : vector<4x1xf32>, vector<4x1xf32> -> vector<4x2xf32>
      %c0_19 = arith.constant 0 : index
      %c0_20 = arith.constant 0 : index
      %37 = vector.load %arg3[%c0_19, %c0_20] : memref<4x2xf32, #tpu.memory_space<vmem>>, vector<4x2xf32>
      tpu.vector_store %arg3[%c0_19, %c0_20], %36 {strides = array<i32>} : memref<4x2xf32, #tpu.memory_space<vmem>>, vector<4x2xf32>,
    } else {
    }
    return
  }
  func.func @transform_0(%arg0: i32, %arg1: i32) -> (i32, i32, i32) {
    %c0_i32 = arith.constant 0 : i32
    %c0_i32_0 = arith.constant 0 : i32
    return %arg0, %c0_i32, %arg1 : i32, i32, i32
  }
  func.func @transform_1(%arg0: i32, %arg1: i32) -> (i32, i32) {
    %c0_i32 = arith.constant 0 : i32
    %c0_i32_0 = arith.constant 0 : i32
    %c0_i32_1 = arith.constant 0 : i32
    return %c0_i32, %c0_i32_0 : i32, i32
  }
}

</mosaic_0001>

<bundles_post_ra>
// kernel: tpu_custom_call.1
= control target key start
LH: loop header
LB: loop body
LE: loop exit
PB: predicated region body
PF: predicated region fallthrough
CT: control target
= control target key end

     0   :  { %6 = vsyncpa [#allocation4], 0  ;;  %s528_s0 = inlined_call_operand.hbm [shape: f32[2,4,256], index: 0, kind: input, shape index: {}]   ;;  %s529_s1 = inlined_call_operand.vmem [shape: f32[4,2], index: 1, kind: output, shape index: {}]  }
   0x1   :  { %8 = vsyncpa [#allocation4 + $0x1], 0  ;;  %s438_s6 = smov 0   ;;  %s440_s7 = smov 0  }
   0x2   :  { %s442_s8 = smov 0   ;;  %s444_s9 = smov 0  }
   0x3   :  { %s446_s10 = smov 0   ;;  %s448_s11 = smov 0  }
   0x4 LB: > { %s268_s12 = sadd.s32 4294967295, %s423_s11   ;;  %s26_s13 = sadd.s32 1, %s419_s10  ;;  %s423_s11 = sphi %s448_s11, %s14_s11   ;;  %s419_s10 = sphi %s446_s10, %s536_s10   ;;  %s415_s9 = sphi %s444_s9, %s535_s9   ;;  %s411_s8 = sphi %s442_s8, %s534_s8   ;;  %s407_s7 = sphi %s440_s7, %s533_s7   ;;  %s403_s6 = sphi %s438_s6, %s532_s6  }
   0x5   : > { %p28_p0 = scmp.ge.s32.totalorder %s26_s13, 2  ;;  %s35_s14 = sadd.s32 1, %s411_s8 }
   0x6   : > { %p42_p1 = scmp.ne.s32.totalorder %s411_s8, %s407_s7  ;;  %p43_p2 = scmp.eq.s32.totalorder %s423_s11, 0 }
   0x7   : > { %s538_s13 = smov (%p28_p0, %s26_s13), 0  ;;  %p48_p4 = scmp.ne.s32.totalorder %s407_s7, %s403_s6 }
   0x8   : > { %p474_p3 = por %p43_p2, %p42_p1  ;;  %s30_s16 = ssub.s32 %s419_s10, %s538_s13 }
   0x9   : > { %p49_p5 = scmp.eq.s32.totalorder %s268_s12, 0  ;;  %p33_p6 = scmp.eq.s32.totalorder %s30_s16, 0 }
   0xa   : > { %p289_p8 = scmp.lt.s32.totalorder %s423_s11, 2  ;;  %s93_s19 = sand.u32 1, %s411_s8  }
   0xb   : > { %p481_p7 = por %p49_p5, %p48_p4  ;;  %s280_s20 = sshll.u32 %s419_s10, 3 }
   0xc   : > { %s487_s18 = scalar_select %p33_p6, %s411_s8, %s35_s14  }
   0xd   : > { %s271_s21 = sshll.u32 %s93_s19, 3  ;;  %s104_s24 = scalar_lea.hbm %s528_s0, %s280_s20 }
   0xe   : > { %s106_s25 = sshll.u32 %s104_s24, 4  ;;  %s97_s26 = scalar_lea.vmem [#allocation3], %s271_s21  ;;  %s107_s25 = int_to_ptr.hbm [resolvable:$true] %s106_s25 }
   0xf   : > { %s108_s27 = sshll.u32 %s97_s26, 4  ;;  %p286_p9 = pnand %p289_p8, %p474_p3  ;;  %s109_s27 = int_to_ptr.vmem [resolvable:$true] %s108_s27 }
  0x10   : > { %p274_p10 = scmp.ge.s32.totalorder %s423_s11, 1  ;;  %p113_p11 = scmp.lt.s32.totalorder %s423_s11, 3 }
  0x11   : > { %s94_s28 = scalar_lea.sflag [#allocation4], %s93_s19 }
  0x12   : > { %288 = dma.hbm_to_vmem [thread:$0]  (!%p286_p9), %s107_s25, 128, %s109_s27, %s94_s28  }
  0x13   : > { %p114_p12 = pnand %p274_p10, %p113_p11 }
  0x14   : > { %s119_s29 = sand.u32 (!%p114_p12), 1, %s407_s7  }
  0x15   : > { %117 = sbr.rel (%p114_p12) target bundleno = 555 (0x22b), region = 24  ;;  %s275_s30 = sshll.u32 (!%p114_p12), %s119_s29, 3 }
  0x16   : > { %s120_s2 = scalar_lea.sflag (!%p114_p12), [#allocation4], %s119_s29  ;;  %s123_s3 = scalar_lea.vmem (!%p114_p12), [#allocation3], %s275_s30 }
  0x1a   : > { %398 = dma.done.wait (%p481_p7), %s120_s2, 128  }
  0x1b   : > { %400 = vsyncadd (%p481_p7), %s120_s2, 4294967168  ;;  %p139_p13 = scmp.eq.s32.totalorder %s415_s9, 0 }
  0x1c   : > { %vm145_vm0 = vcmask (%p139_p13), 11264   ;;  %v425_v0 = vmov (%p139_p13), 0.0  }
  0x1d   : > { %144 = sbr.rel (!%p139_p13) target bundleno = 34 (0x22), region = 32  ;;  %146 = vst.msk [vmem:[#allocation2] sm:$0xf] (%p139_p13), %vm145_vm0, %v425_v0 }
  0x22 PF: > { %v147_v1 = vld [vmem:[%s123_s3] sm:$0xff]  ;;  %vm155_vm1 = vcmask 1043456   ;;  %p180_p0 = scmp.eq.s32.totalorder %s415_s9, 1  ;;  %vm162_vm2 = vcmask 3072   ;;  %vm178_vm3 = vcmask 11272  }
  0x23   : > { %150 = vst [vmem:[#allocation1] ss:$2 sm:$0xff] %v147_v1  ;;  %v165_v2 = vmul.f32 %v147_v1, %v147_v1  ;;  %s426_s4 = smov (%p180_p0), 1   ;;  %s427_s5 = smov (%p180_p0), 127   ;;  %vm213_vm7 = vcmask (%p180_p0), 7168   ;;  %vm215_vm8 = vcmask (%p180_p0), 11264  }
  0x24   : > { %v148_v13 = vld [vmem:[#allocation2] sm:$0xf] }
  0x2a   : > { %v151_v3 = vld.sshfl [vmem:[#allocation1] sm:$0xff pattern:$0x75316420]  ;;  %v152_v4 = vld.sshfl [vmem:[#allocation1 + $0x8] sm:$0xff pattern:$0x75316420] }
  0x2b   : > { %v156_v5 = vsel %vm155_vm1, %v151_v3, 0.0  ;;  %v157_v6 = vsel %vm155_vm1, %v152_v4, 0.0  ;;  %167 = vst [vmem:[#allocation1] ss:$2 sm:$0xff] %v165_v2 }
  0x2c   : > { %v158_v7 = vadd.f32 %v157_v6, %v156_v5 }
  0x2e   : > { %159 = vadd.xlane.f32.xlu0 %v158_v7 }
  0x32   : > { %v168_v8 = vld.sshfl [vmem:[#allocation1] sm:$0xff pattern:$0x75316420]  ;;  %v169_v9 = vld.sshfl [vmem:[#allocation1 + $0x8] sm:$0xff pattern:$0x75316420] }
  0x33   : > { %v172_v10 = vsel %vm155_vm1, %v168_v8, 0.0  ;;  %v173_v11 = vsel %vm155_vm1, %v169_v9, 0.0 }
  0x34   : > { %v174_v12 = vadd.f32 %v173_v11, %v172_v10 }
  0x36   : > { %175 = vadd.xlane.f32.xlu0 %v174_v12 }
  0xa1   : > { %v160_v14 = vpop.xlane.xlu0 %159 }
  0xa2   : > { %v161_v15 = vadd.f32 %v160_v14, %v148_v13 }
  0xa4   : > { %163 = vst.msk [vmem:[#allocation2] sm:$0xf] %vm162_vm2, %v161_v15 }
  0xa9   : > { %v176_v16 = vpop.xlane.xlu0 %175 }
  0xaa   : > { %184 = sbr.rel (!%p180_p0) target bundleno = 555 (0x22b), region = 36 }
  0xab   : > { %v164_v17 = vld [vmem:[#allocation2] sm:$0xf] }
  0xac   : > { %v177_v18 = vadd.f32 %v176_v16, %v164_v17 }
  0xae   : > { %179 = vst.msk [vmem:[#allocation2] sm:$0xf] %vm178_vm3, %v177_v18 }
  0xb5   : > { %v185_v19 = vld [vmem:[#allocation2] sm:$0xf] }
  0xb6   : > { %v186_v20 = vmul.f32 0.001953125, %v185_v19 }
  0xb8   : > { %v187_v21 = vmul.f32 %v186_v20, %v186_v20  ;;  %v203_v31 = vsub.f32 0.0, %v186_v20 }
  0xba   : > { %189 = vrot.lane.b32.xlu0 %v187_v21, %s426_s4 }
 0x12c   : > { %v190_v22 = vpop.permute.xlu0 %189 }
 0x12d   : > { %v192_v23 = vsub.f32 %v186_v20, %v190_v22 }
 0x12f   : > { %341 = vrsqrt.f32 %v192_v23  ;;  %vm199_vm5 = vweird.f32 %v192_v23 }
 0x135   : > { %v342_v24 = vpop.eup %341 }
 0x136   : > { %v194_v25 = vmul.f32 %v342_v24, %v192_v23  ;;  %vm200_vm4 = vweird.f32 %v342_v24 }
 0x137   : > { %vm201_vm6 = vmor %vm199_vm5, %vm200_vm4 }
 0x138   : > { %v195_v26 = vmul.f32 %v342_v24, %v194_v25 }
 0x13a   : > { %v196_v27 = vmul.f32 0.5, %v195_v26 }
 0x13c   : > { %v197_v28 = vsub.f32 1.5, %v196_v27 }
 0x13e   : > { %v198_v29 = vmul.f32 %v342_v24, %v197_v28 }
 0x140   : > { %v202_v30 = vsel %vm201_vm6, %v342_v24, %v198_v29 }
 0x141   : > { %205 = vrot.lane.b32.xlu0 %v202_v30, %s427_s5 }
 0x1b3   : > { %v206_v32 = vpop.permute.xlu0 %205 }
 0x1b4   : > { %v208_v33 = vmul.f32 %v206_v32, %v203_v31 }
 0x1b6   : > { %210 = vrot.lane.b32.xlu1 %v208_v33, %s426_s4 }
 0x228   : > { %v211_v34 = vpop.permute.xlu1 %210 }
 0x229   : > { %v214_v35 = vsel %vm213_vm7, %v206_v32, %v211_v34 }
 0x22a   : > { %216 = vst.msk [vmem:[%s529_s1] sm:$0xf] %vm215_vm8, %v214_v35 }
 0x22b PF: > { %s14_s11 = sadd.s32 1, %s423_s11   ;;  %s532_s6 = smov %s407_s7 }
 0x22c   : > { %p11_p1 = scmp.ge.s32.totalorder %s14_s11, 4   ;;  %s533_s7 = smov %s411_s8 }
 0x22d   : > { %s534_s8 = smov %s487_s18  ;;  %s535_s9 = smov %s419_s10 }
 0x22e   : > { %s536_s10 = smov %s538_s13  ;;  %13 = sbr.rel (!%p11_p1) target bundleno = 4 (0x4), region = 68 }
 0x233   :  { %228 = vsyncpa [#allocation4], 1 }
 0x234   :  { %230 = vsyncpa [#allocation4 + $0x1], 1 }

</bundles_post_ra>
